<compile_context>
chip_gen: v5e
topology: v5e:2x2
jax: 0.10.0
libtpu: 0.0.40
codegen_flags: <defaults>
</compile_context>

<pallas_src>
import numpy as np
import jax
import jax.numpy as jnp
from jax.experimental import pallas as pl
from jax.experimental.pallas import tpu as pltpu


FEATURE_DIMS = 32        # fc0 input features
FC_OUT = 192             # 3 * 8 * 8
SLAB = 256               # lane-aligned width of each max-pool candidate slab
POOL_COLS = 3 * 3 * 16   # live columns per slab (pooled 3x3 spatial x 16 ch)


# ----------------------------------------------------------------------------
# Glue: parameter re-layout (numpy, runs once per encoder construction)
# ----------------------------------------------------------------------------
def _conv2x2_toeplitz(w_oihw, H, W):
    """2x2 VALID conv (NHWC-flat in / NHWC-flat out) as a dense matmul matrix."""
    OC, IC, KH, KW = w_oihw.shape
    Ho, Wo = H - KH + 1, W - KW + 1
    T = np.zeros((H * W * IC, Ho * Wo * OC), dtype=np.float32)
    for i in range(Ho):
        for j in range(Wo):
            out_base = (i * Wo + j) * OC
            for kh in range(KH):
                for kw in range(KW):
                    for c in range(IC):
                        in_idx = ((i + kh) * W + (j + kw)) * IC + c
                        T[in_idx, out_base:out_base + OC] = w_oihw[:, c, kh, kw]
    return T


def _nchw_to_nhwc_col_perm(C, H, W):
    """perm[nhwc_flat_index] = nchw_flat_index."""
    perm = np.zeros(C * H * W, dtype=np.int64)
    for i in range(H):
        for j in range(W):
            for c in range(C):
                perm[(i * W + j) * C + c] = c * H * W + i * W + j
    return perm


# ----------------------------------------------------------------------------
# Pallas kernel: fused(fc0+conv1)+relu -> maxpool -> conv2+relu -> conv3+relu
# ----------------------------------------------------------------------------
def _encoder_kernel(x_ref, w01_ref, b01_ref, t2_ref, b2_ref, t3_ref, b3_ref,
                    o_ref):
    # Fused fc0 + Conv2d(3,16,2x2) + bias + ReLU.  Columns are pre-permuted
    # into 4 pool-candidate slabs of width SLAB (dead conv1 columns removed,
    # padding lanes are exactly zero by construction).
    h = jnp.dot(x_ref[...], w01_ref[...], preferred_element_type=jnp.float32)
    h = jnp.maximum(h + b01_ref[...], 0.0)                       # (TB, 4*SLAB)

    # MaxPool2d((2,2)): three full-width maxima on lane-aligned 256-wide slabs.
    p = jnp.maximum(
        jnp.maximum(h[:, 0 * SLAB:1 * SLAB], h[:, 1 * SLAB:2 * SLAB]),
        jnp.maximum(h[:, 2 * SLAB:3 * SLAB], h[:, 3 * SLAB:4 * SLAB]))

    # Conv2d(16,32,2x2) + ReLU: Toeplitz matmul, K zero-padded to SLAB.
    y2 = jnp.dot(p.astype(t2_ref.dtype), t2_ref[...],
                 preferred_element_type=jnp.float32) + b2_ref[...]
    y2 = jnp.maximum(y2, 0.0)                                    # (TB, 128)

    # Conv2d(32,64,2x2) + ReLU: output zero-padded to 128 lanes (dense store).
    y3 = jnp.dot(y2.astype(t3_ref.dtype), t3_ref[...],
                 preferred_element_type=jnp.float32) + b3_ref[...]
    o_ref[...] = jnp.maximum(y3, 0.0).astype(o_ref.dtype)        # (TB, 128)


# ----------------------------------------------------------------------------
# Encoder factory: weight prep once, jitted forward closure
# ----------------------------------------------------------------------------
def make_random_encoder(params, *, tile_b=256, compute_dtype=jnp.float32):
    """params = (w0, b0, w1, b1, w2, b2, w3, b3) in PyTorch layouts.
    tile_b must be a multiple of 8 (maximum batch tile for the grid)."""
    assert tile_b % 8 == 0, "tile_b must be a multiple of 8"
    w0, b0, w1, b1, w2, b2, w3, b3 = (np.asarray(p, np.float32) for p in params)
    F = w0.shape[1]

    # fc0: permute output columns NCHW-flat (3,8,8) -> NHWC-flat (8,8,3).
    perm = _nchw_to_nhwc_col_perm(3, 8, 8)
    w0k = w0.T[:, perm]                          # (F, 192)
    b0k = b0[perm]                               # (192,)

    # conv1 Toeplitz: drop dead columns (spatial i==6 or j==6 never pooled),
    # permute the rest into 4 lane-aligned pool-candidate slabs of width SLAB.
    t1 = _conv2x2_toeplitz(w1, 8, 8)             # (192, 7*7*16)
    b1t = np.tile(b1, 7 * 7)                     # (784,)
    t1s = np.zeros((FC_OUT, 4 * SLAB), np.float32)
    b1s = np.zeros((4 * SLAB,), np.float32)
    for di in range(2):
        for dj in range(2):
            s = di * 2 + dj
            for oi in range(3):
                for oj in range(3):
                    src = ((2 * oi + di) * 7 + (2 * oj + dj)) * 16
                    dst = s * SLAB + (oi * 3 + oj) * 16
                    t1s[:, dst:dst + 16] = t1[:, src:src + 16]
                    b1s[dst:dst + 16] = b1t[src:src + 16]

    # Fold fc0 into conv1 (no nonlinearity between them).
    w01 = w0k @ t1s                              # (F, 1024)
    b01 = b0k @ t1s + b1s                        # (1024,)

    # conv2 Toeplitz, K zero-padded 144 -> SLAB so the pooled slab feeds it.
    t2 = _conv2x2_toeplitz(w2, 3, 3)             # (144, 128)
    t2p = np.zeros((SLAB, 128), np.float32)
    t2p[:POOL_COLS] = t2
    b2t = np.tile(b2, 2 * 2)                     # (128,)

    # conv3 Toeplitz, N zero-padded 64 -> 128 for a lane-dense output store.
    t3 = _conv2x2_toeplitz(w3, 2, 2)             # (128, 64)
    t3p = np.zeros((128, 128), np.float32)
    t3p[:, :64] = t3
    b3p = np.zeros((128,), np.float32)
    b3p[:64] = b3

    # Upload once; biases stay f32 and elementwise math is kept f32 (safe on
    # v5e which has no bf16 VPU path).
    # Note: compute_dtype=jnp.bfloat16 is the recommended setting on v6e/v7x
    # (native MXU dtype, halves weight/activation traffic); it loosens parity
    # with the f32 PyTorch module to ~1e-2.
    w01_d = jnp.asarray(w01, compute_dtype)
    b01_d = jnp.asarray(b01[None, :], jnp.float32)
    t2_d = jnp.asarray(t2p, compute_dtype)
    b2_d = jnp.asarray(b2t[None, :], jnp.float32)
    t3_d = jnp.asarray(t3p, compute_dtype)
    b3_d = jnp.asarray(b3p[None, :], jnp.float32)

    n_h = 4 * SLAB  # 1024

    @jax.jit
    def forward(x):
        B = x.shape[0]
        # Adaptive batch tile: never pad a small batch to a full 256-row tile.
        tb = min(tile_b, max(8, -(-B // 8) * 8))
        n_blk = -(-B // tb)                      # ceil-div
        Bp = n_blk * tb
        xp = jnp.pad(x.astype(compute_dtype), ((0, Bp - B), (0, 0)))

        out = pl.pallas_call(
            _encoder_kernel,
            out_shape=jax.ShapeDtypeStruct((Bp, 128), jnp.float32),
            grid_spec=pltpu.PrefetchScalarGridSpec(
                num_scalar_prefetch=0,
                grid=(n_blk,),
                in_specs=[
                    pl.BlockSpec((tb, F), lambda i: (i, 0)),       # x (tiled)
                    pl.BlockSpec((F, n_h), lambda i: (0, 0)),      # fused w01
                    pl.BlockSpec((1, n_h), lambda i: (0, 0)),      # fused bias
                    pl.BlockSpec((SLAB, 128), lambda i: (0, 0)),   # conv2 T
                    pl.BlockSpec((1, 128), lambda i: (0, 0)),      # conv2 bias
                    pl.BlockSpec((128, 128), lambda i: (0, 0)),    # conv3 T
                    pl.BlockSpec((1, 128), lambda i: (0, 0)),      # conv3 bias
                ],
                out_specs=pl.BlockSpec((tb, 128), lambda i: (i, 0)),
            ),
            compiler_params=pltpu.CompilerParams(
                dimension_semantics=("parallel",)),
        )(xp, w01_d, b01_d, t2_d, b2_d, t3_d, b3_d)

        # PyTorch returns NCHW (B, 64, 1, 1); with 1x1 spatial NHWC == NCHW.
        return out[:B, :64].reshape(B, 64, 1, 1)

    return forward


# ----------------------------------------------------------------------------
# Pure-JAX reference (correctness check only)
# ----------------------------------------------------------------------------
def _reference_forward(x, params):
    w0, b0, w1, b1, w2, b2, w3, b3 = params
    h = x @ w0.T + b0
    img = h.reshape(-1, 3, 8, 8)

    def conv(inp, w, b):
        out = jax.lax.conv_general_dilated(
            inp, w, (1, 1), 'VALID',
            dimension_numbers=('NCHW', 'OIHW', 'NCHW'))
        return out + b[None, :, None, None]

    y = jax.nn.relu(conv(img, w1, b1))
    y = jax.lax.reduce_window(y, -jnp.inf, jax.lax.max,
                              (1, 1, 2, 2), (1, 1, 2, 2), 'VALID')
    y = jax.nn.relu(conv(y, w2, b2))
    y = jax.nn.relu(conv(y, w3, b3))
    return y


if __name__ == "__main__":
    key = jax.random.PRNGKey(0)
    ks = jax.random.split(key, 10)
    B = 50  # small, not a multiple of 8 (exercises batch padding + adaptive tile)
    x = jax.random.normal(ks[0], (B, FEATURE_DIMS), dtype=jnp.float32)

    # Deterministic parameters. Conv weights/biases ~ N(0, 0.1) as in __init__.
    w0 = jax.random.normal(ks[1], (FC_OUT, FEATURE_DIMS), jnp.float32) * 0.1
    b0 = jax.random.normal(ks[2], (FC_OUT,), jnp.float32) * 0.1
    w1 = jax.random.normal(ks[3], (16, 3, 2, 2), jnp.float32) * 0.1
    b1 = jax.random.normal(ks[4], (16,), jnp.float32) * 0.1
    w2 = jax.random.normal(ks[5], (32, 16, 2, 2), jnp.float32) * 0.1
    b2 = jax.random.normal(ks[6], (32,), jnp.float32) * 0.1
    w3 = jax.random.normal(ks[7], (64, 32, 2, 2), jnp.float32) * 0.1
    b3 = jax.random.normal(ks[8], (64,), jnp.float32) * 0.1
    params = (w0, b0, w1, b1, w2, b2, w3, b3)

    ref = _reference_forward(x, params)

    # f32 path: strict parity with the f32 PyTorch module.
    fwd = make_random_encoder(params, tile_b=256, compute_dtype=jnp.float32)
    out = jax.block_until_ready(fwd(x))
    assert out.shape == (B, 64, 1, 1)
    if not jnp.allclose(out, ref, atol=1e-4, rtol=1e-4):
        raise AssertionError("f32 Pallas kernel output does not match reference")

    # bf16 weights/activations (recommended on v6e/v7x MXU): relaxed parity.
    fwd_bf16 = make_random_encoder(params, tile_b=256,
                                   compute_dtype=jnp.bfloat16)
    out_bf16 = jax.block_until_ready(fwd_bf16(x))
    if not jnp.allclose(out_bf16, ref, atol=5e-2, rtol=5e-2):
        raise AssertionError("bf16 Pallas kernel output too far from reference")

    print("KERNEL_OK")
</pallas_src>

<mosaic_0001>
module attributes {stable_mosaic.version = 11 : i64} {
  func.func @_encoder_kernel(%arg0: i32, %arg1: memref<56x32xf32, #tpu.memory_space<vmem>>, %arg2: memref<32x1024xf32, #tpu.memory_space<vmem>>, %arg3: memref<1x1024xf32, #tpu.memory_space<vmem>>, %arg4: memref<256x128xf32, #tpu.memory_space<vmem>>, %arg5: memref<1x128xf32, #tpu.memory_space<vmem>>, %arg6: memref<128x128xf32, #tpu.memory_space<vmem>>, %arg7: memref<1x128xf32, #tpu.memory_space<vmem>>, %arg8: memref<56x128xf32, #tpu.memory_space<vmem>>) attributes {dimension_semantics = [#tpu.dimension_semantics<parallel>], iteration_bounds = array<i64: 1>, scalar_prefetch = 0 : i64, scratch_operands = 0 : i64, tpu.core_type = #tpu.core_type<tc>, window_params = [{transform_indices = @transform_0, window_bounds = array<i64: 56, 32>}, {pipeline_mode = #tpu.pipeline_mode<synchronous>, transform_indices = @transform_1, window_bounds = array<i64: 32, 1024>}, {pipeline_mode = #tpu.pipeline_mode<synchronous>, transform_indices = @transform_2, window_bounds = array<i64: 1, 1024>}, {pipeline_mode = #tpu.pipeline_mode<synchronous>, transform_indices = @transform_3, window_bounds = array<i64: 256, 128>}, {pipeline_mode = #tpu.pipeline_mode<synchronous>, transform_indices = @transform_4, window_bounds = array<i64: 1, 128>}, {pipeline_mode = #tpu.pipeline_mode<synchronous>, transform_indices = @transform_5, window_bounds = array<i64: 128, 128>}, {pipeline_mode = #tpu.pipeline_mode<synchronous>, transform_indices = @transform_6, window_bounds = array<i64: 1, 128>}, {transform_indices = @transform_7, window_bounds = array<i64: 56, 128>}]} {
    %c0 = arith.constant 0 : index
    %c0_0 = arith.constant 0 : index
    %0 = vector.load %arg1[%c0, %c0_0] : memref<56x32xf32, #tpu.memory_space<vmem>>, vector<56x32xf32>
    %c0_1 = arith.constant 0 : index
    %c0_2 = arith.constant 0 : index
    %1 = vector.load %arg2[%c0_1, %c0_2] : memref<32x1024xf32, #tpu.memory_space<vmem>>, vector<32x1024xf32>
    %cst = arith.constant dense<0.000000e+00> : vector<56x1024xf32>
    %2 = tpu.matmul %0, %1, %cst {dimension_numbers = #tpu.dot_dimension_numbers<[1], [0], [0], [1], [0, 0, 1, 1], [], []>} : vector<56x32xf32>, vector<32x1024xf32>, vector<56x1024xf32> -> vector<56x1024xf32>
    %c0_3 = arith.constant 0 : index
    %c0_4 = arith.constant 0 : index
    %3 = vector.load %arg3[%c0_3, %c0_4] : memref<1x1024xf32, #tpu.memory_space<vmem>>, vector<1x1024xf32>
    %4 = vector.broadcast %3 : vector<1x1024xf32> to vector<56x1024xf32>
    %5 = arith.addf %2, %4 : vector<56x1024xf32>
    %cst_5 = arith.constant 0.000000e+00 : f32
    %6 = vector.broadcast %cst_5 : f32 to vector<56x1024xf32>
    %7 = arith.maximumf %5, %6 : vector<56x1024xf32>
    %8 = vector.extract_strided_slice %7 {offsets = [0, 0], sizes = [56, 256], strides = [1, 1]} : vector<56x1024xf32> to vector<56x256xf32>
    %9 = vector.extract_strided_slice %7 {offsets = [0, 256], sizes = [56, 256], strides = [1, 1]} : vector<56x1024xf32> to vector<56x256xf32>
    %10 = arith.maximumf %8, %9 : vector<56x256xf32>
    %11 = vector.extract_strided_slice %7 {offsets = [0, 512], sizes = [56, 256], strides = [1, 1]} : vector<56x1024xf32> to vector<56x256xf32>
    %12 = vector.extract_strided_slice %7 {offsets = [0, 768], sizes = [56, 256], strides = [1, 1]} : vector<56x1024xf32> to vector<56x256xf32>
    %13 = arith.maximumf %11, %12 : vector<56x256xf32>
    %14 = arith.maximumf %10, %13 : vector<56x256xf32>
    %c0_6 = arith.constant 0 : index
    %c0_7 = arith.constant 0 : index
    %15 = vector.load %arg4[%c0_6, %c0_7] : memref<256x128xf32, #tpu.memory_space<vmem>>, vector<256x128xf32>
    %cst_8 = arith.constant dense<0.000000e+00> : vector<56x128xf32>
    %16 = tpu.matmul %14, %15, %cst_8 {dimension_numbers = #tpu.dot_dimension_numbers<[1], [0], [0], [1], [0, 0, 1, 1], [], []>} : vector<56x256xf32>, vector<256x128xf32>, vector<56x128xf32> -> vector<56x128xf32>
    %c0_9 = arith.constant 0 : index
    %c0_10 = arith.constant 0 : index
    %17 = vector.load %arg5[%c0_9, %c0_10] : memref<1x128xf32, #tpu.memory_space<vmem>>, vector<1x128xf32>
    %18 = vector.broadcast %17 : vector<1x128xf32> to vector<56x128xf32>
    %19 = arith.addf %16, %18 : vector<56x128xf32>
    %cst_11 = arith.constant 0.000000e+00 : f32
    %20 = vector.broadcast %cst_11 : f32 to vector<56x128xf32>
    %21 = arith.maximumf %19, %20 : vector<56x128xf32>
    %c0_12 = arith.constant 0 : index
    %c0_13 = arith.constant 0 : index
    %22 = vector.load %arg6[%c0_12, %c0_13] : memref<128x128xf32, #tpu.memory_space<vmem>>, vector<128x128xf32>
    %cst_14 = arith.constant dense<0.000000e+00> : vector<56x128xf32>
    %23 = tpu.matmul %21, %22, %cst_14 {dimension_numbers = #tpu.dot_dimension_numbers<[1], [0], [0], [1], [0, 0, 1, 1], [], []>} : vector<56x128xf32>, vector<128x128xf32>, vector<56x128xf32> -> vector<56x128xf32>
    %c0_15 = arith.constant 0 : index
    %c0_16 = arith.constant 0 : index
    %24 = vector.load %arg7[%c0_15, %c0_16] : memref<1x128xf32, #tpu.memory_space<vmem>>, vector<1x128xf32>
    %25 = vector.broadcast %24 : vector<1x128xf32> to vector<56x128xf32>
    %26 = arith.addf %23, %25 : vector<56x128xf32>
    %cst_17 = arith.constant 0.000000e+00 : f32
    %27 = vector.broadcast %cst_17 : f32 to vector<56x128xf32>
    %28 = arith.maximumf %26, %27 : vector<56x128xf32>
    %c0_18 = arith.constant 0 : index
    %c0_19 = arith.constant 0 : index
    %29 = vector.load %arg8[%c0_18, %c0_19] : memref<56x128xf32, #tpu.memory_space<vmem>>, vector<56x128xf32>
    tpu.vector_store %arg8[%c0_18, %c0_19], %28 {strides = array<i32>} : memref<56x128xf32, #tpu.memory_space<vmem>>, vector<56x128xf32>,
    return
  }
  func.func @transform_0(%arg0: i32) -> (i32, i32) {
    %c0_i32 = arith.constant 0 : i32
    %c0_i32_0 = arith.constant 0 : i32
    return %arg0, %c0_i32 : i32, i32
  }
  func.func @transform_1(%arg0: i32) -> (i32, i32) {
    %c0_i32 = arith.constant 0 : i32
    %c0_i32_0 = arith.constant 0 : i32
    %c0_i32_1 = arith.constant 0 : i32
    return %c0_i32, %c0_i32_0 : i32, i32
  }
  func.func @transform_2(%arg0: i32) -> (i32, i32) {
    %c0_i32 = arith.constant 0 : i32
    %c0_i32_0 = arith.constant 0 : i32
    %c0_i32_1 = arith.constant 0 : i32
    return %c0_i32, %c0_i32_0 : i32, i32
  }
  func.func @transform_3(%arg0: i32) -> (i32, i32) {
    %c0_i32 = arith.constant 0 : i32
    %c0_i32_0 = arith.constant 0 : i32
    %c0_i32_1 = arith.constant 0 : i32
    return %c0_i32, %c0_i32_0 : i32, i32
  }
  func.func @transform_4(%arg0: i32) -> (i32, i32) {
    %c0_i32 = arith.constant 0 : i32
    %c0_i32_0 = arith.constant 0 : i32
    %c0_i32_1 = arith.constant 0 : i32
    return %c0_i32, %c0_i32_0 : i32, i32
  }
  func.func @transform_5(%arg0: i32) -> (i32, i32) {
    %c0_i32 = arith.constant 0 : i32
    %c0_i32_0 = arith.constant 0 : i32
    %c0_i32_1 = arith.constant 0 : i32
    return %c0_i32, %c0_i32_0 : i32, i32
  }
  func.func @transform_6(%arg0: i32) -> (i32, i32) {
    %c0_i32 = arith.constant 0 : i32
    %c0_i32_0 = arith.constant 0 : i32
    %c0_i32_1 = arith.constant 0 : i32
    return %c0_i32, %c0_i32_0 : i32, i32
  }
  func.func @transform_7(%arg0: i32) -> (i32, i32) {
    %c0_i32 = arith.constant 0 : i32
    %c0_i32_0 = arith.constant 0 : i32
    return %arg0, %c0_i32 : i32, i32
  }
}

</mosaic_0001>

<bundles_post_ra>
// kernel: forward.1
= control target key start
LH: loop header
LB: loop body
LE: loop exit
PB: predicated region body
PF: predicated region fallthrough
CT: control target
= control target key end

     0   :  { %12 = vsyncpa [#allocation3], 0  ;;  %s1287_s0 = inlined_call_operand.vmem [shape: f32[56,32], index: 0, kind: input, shape index: {}]   ;;  %s1288_s1 = inlined_call_operand.hbm [shape: f32[32,1024], index: 1, kind: input, shape index: {}]   ;;  %s1289_s2 = inlined_call_operand.vmem [shape: f32[1,1024], index: 2, kind: input, shape index: {}]   ;;  %s1290_s3 = inlined_call_operand.hbm [shape: f32[256,128], index: 3, kind: input, shape index: {}]   ;;  %s1291_s4 = inlined_call_operand.vmem [shape: f32[1,128], index: 4, kind: input, shape index: {}]   ;;  %s1292_s5 = inlined_call_operand.vmem [shape: f32[128,128], index: 5, kind: input, shape index: {}]   ;;  %s1293_s6 = inlined_call_operand.vmem [shape: f32[1,128], index: 6, kind: input, shape index: {}]   ;;  %s1294_s7 = inlined_call_operand.vmem [shape: f32[56,128], index: 7, kind: output, shape index: {}]  }
   0x1   :  { %s20_s26 = sshll.u32 %s1288_s1, 4  ;;  %s21_s26 = int_to_ptr.hbm [resolvable:$true] %s20_s26 }
   0x2   :  { %13 = vsyncpa [#allocation5], 0  ;;  %s864_s27 = smov [#allocation2]   ;;  %s35_s8 = sshll.u32 %s1290_s3, 4  ;;  %s36_s8 = int_to_ptr.hbm [resolvable:$true] %s35_s8 }
   0x3   :  { %s22_s28 = sshll.u32 %s864_s27, 4  ;;  %s865_s9 = smov 1024   ;;  %s23_s28 = int_to_ptr.vmem [resolvable:$true] %s22_s28 }
   0x4   :  { %s866_s10 = smov 64   ;;  %s867_s11 = smov [#allocation4]  }
   0x5   :  { %28 = dma.hbm_to_vmem [thread:$0]  %s21_s26, 4096, %s23_s28, [#allocation3], %s865_s9, %s865_s9, %s866_s10  }
   0x6   :  { %s37_s12 = sshll.u32 %s867_s11, 4  ;;  %s868_s13 = smov 128   ;;  %s38_s12 = int_to_ptr.vmem [resolvable:$true] %s37_s12 }
   0x7   :  { %s869_s14 = smov 8  }
   0x8   :  { %43 = dma.hbm_to_vmem [thread:$0]  %s36_s8, 4096, %s38_s12, [#allocation5], %s868_s13, %s868_s13, %s869_s14  }
   0x9   :  { %860 = dma.done.wait [#allocation3], 4096  }
   0xa   :  { %861 = vsyncadd [#allocation3], 4294963200 }
   0xb   :  { %862 = dma.done.wait [#allocation5], 4096  }
   0xc   :  { %863 = vsyncadd [#allocation5], 4294963200  ;;  %v89_v0 = vld [vmem:[#allocation2 + $0xc0] sm:$0xff]  ;;  %v90_v1 = vld [vmem:[#allocation2 + $0xc8] sm:$0xff]  ;;  %vm115_vm0 = vcmask 261120  }
   0xd   :  { %v91_v2 = vld [vmem:[#allocation2 + $0xd0] sm:$0xff]  ;;  %149 = vmatpush.msra.mxu0 %v89_v0  ;;  %792 = vmatpush.msra.mxu3 %v90_v1  ;;  %v81_v3 = vld [vmem:[#allocation2 + $0x80] sm:$0xff]  ;;  %v82_v4 = vld [vmem:[#allocation2 + $0x88] sm:$0xff] }
   0xe   :  { %v83_v5 = vld [vmem:[#allocation2 + $0x90] sm:$0xff]  ;;  %796 = vmatpush.msra.mxu2 %v91_v2  ;;  %v73_v6 = vld [vmem:[#allocation2 + $0x40] sm:$0xff]  ;;  %v74_v7 = vld [vmem:[#allocation2 + $0x48] sm:$0xff]  ;;  %187 = vmatpush.msra.mxu1 %v90_v1 }
   0xf   :  { %150 = vmatpush.msra.mxu0 %v81_v3  ;;  %793 = vmatpush.msra.mxu3 %v82_v4  ;;  %v75_v8 = vld [vmem:[#allocation2 + $0x50] sm:$0xff]  ;;  %v65_v9 = vld [vmem:[#allocation2] sm:$0xff]  ;;  %v66_v10 = vld [vmem:[#allocation2 + $0x8] sm:$0xff] }
  0x10   :  { %797 = vmatpush.msra.mxu2 %v83_v5  ;;  %188 = vmatpush.msra.mxu1 %v82_v4  ;;  %v67_v11 = vld [vmem:[#allocation2 + $0x10] sm:$0xff]  ;;  %v919_v12 = vld [vmem:[%s1287_s0] sm:$0xff]  ;;  %v929_v14 = vld [vmem:[%s1287_s0 + $0x8] sm:$0xff] }
  0x11   :  { %151 = vmatpush.msra.mxu0 %v73_v6  ;;  %794 = vmatpush.msra.mxu3 %v74_v7  ;;  %v924_v13 = vld [vmem:[%s1287_s0 + $0x30] sm:$0xff]  ;;  %v92_v15 = vld [vmem:[#allocation2 + $0xd8] sm:$0xff]  ;;  %v93_v21 = vld [vmem:[#allocation2 + $0xe0] sm:$0xff] }
  0x12   :  { %798 = vmatpush.msra.mxu2 %v75_v8  ;;  %189 = vmatpush.msra.mxu1 %v74_v7  ;;  %v84_v16 = vld [vmem:[#allocation2 + $0x98] sm:$0xff]  ;;  %v95_v17 = vld [vmem:[#allocation2 + $0xf0] sm:$0xff]  ;;  %v85_v22 = vld [vmem:[#allocation2 + $0xa0] sm:$0xff] }
  0x13   :  { %152 = vmatpush.msra.mxu0 %v65_v9  ;;  %795 = vmatpush.msra.mxu3 %v66_v10  ;;  %v76_v18 = vld [vmem:[#allocation2 + $0x58] sm:$0xff]  ;;  %v942_v20 = vld [vmem:[%s1287_s0 + $0x10] sm:$0xff]  ;;  %v94_v25 = vld [vmem:[#allocation2 + $0xe8] sm:$0xff] }
  0x14   :  { %799 = vmatpush.msra.mxu2 %v67_v11  ;;  %736 = vmatmul.msk.f32.vlgmr.msra.gmra.mxu0 %vm115_vm0, %v919_v12  ;;  %v68_v19 = vld [vmem:[#allocation2 + $0x18] sm:$0xff]  ;;  %v87_v23 = vld [vmem:[#allocation2 + $0xb0] sm:$0xff]  ;;  %v77_v26 = vld [vmem:[#allocation2 + $0x60] sm:$0xff] }
  0x15   :  { %749 = vmatmul.msk.f32.vlgmr.msra.gmra.mxu3 %vm115_vm0, %v924_v13  ;;  %751 = vmatmul.msk.f32.vlgmr.msra.gmra.mxu2 %vm115_vm0, %v929_v14  ;;  %v79_v24 = vld [vmem:[#allocation2 + $0x70] sm:$0xff]  ;;  %v955_v28 = vld [vmem:[%s1287_s0 + $0x18] sm:$0xff]  ;;  %v69_v29 = vld [vmem:[#allocation2 + $0x20] sm:$0xff] }
  0x16   :  { %263 = vmatpush.msrb.mxu3 %v92_v15  ;;  %190 = vmatpush.msra.mxu1 %v66_v10  ;;  %v71_v27 = vld [vmem:[#allocation2 + $0x30] sm:$0xff]  ;;  %v62_v30 = vld [vmem:[%s1287_s0 + $0x20] sm:$0xff]  ;;  %v86_v31 = vld [vmem:[#allocation2 + $0xa8] sm:$0xff] }
  0x17   :  { %743 = vmatmul.msk.f32.vlgmr.msra.gmra.mxu1 %vm115_vm0, %v919_v12  ;;  %225 = vmatpush.msrb.mxu0 %v91_v2  ;;  %v63_v32 = vld [vmem:[%s1287_s0 + $0x28] sm:$0xff]  ;;  %v96_v33 = vld [vmem:[#allocation2 + $0xf8] sm:$0xff]  ;;  %v553_v44 = vld [vmem:[#allocation4 + $0x70] sm:$0xff] }
  0x18   :  { %264 = vmatpush.msrb.mxu3 %v84_v16  ;;  %377 = vmatpush.msrb.mxu2 %v95_v17  ;;  %v78_v34 = vld [vmem:[#allocation2 + $0x68] sm:$0xff]  ;;  %v88_v35 = vld [vmem:[#allocation2 + $0xb8] sm:$0xff]  ;;  %v551_v49 = vld [vmem:[#allocation4 + $0x60] sm:$0xff] }
  0x19   :  { %226 = vmatpush.msrb.mxu0 %v83_v5  ;;  %339 = vmatpush.msrb.mxu1 %v94_v25  ;;  %v80_v36 = vld [vmem:[#allocation2 + $0x78] sm:$0xff]  ;;  %v70_v37 = vld [vmem:[#allocation2 + $0x28] sm:$0xff]  ;;  %v549_v53 = vld [vmem:[#allocation4 + $0x50] sm:$0xff] }
  0x1a   :  { %265 = vmatpush.msrb.mxu3 %v76_v18  ;;  %378 = vmatpush.msrb.mxu2 %v87_v23  ;;  %v72_v38 = vld [vmem:[#allocation2 + $0x38] sm:$0xff]  ;;  %v552_v45 = vld [vmem:[#allocation4 + $0x68] sm:$0xff]  ;;  %v569_v54 = vld [vmem:[#allocation4 + $0xf0] sm:$0xff] }
  0x1b   :  { %227 = vmatpush.msrb.mxu0 %v75_v8  ;;  %340 = vmatpush.msrb.mxu1 %v86_v31  ;;  %v554_v43 = vld [vmem:[#allocation4 + $0x78] sm:$0xff]  ;;  %v548_v55 = vld [vmem:[#allocation4 + $0x48] sm:$0xff]  ;;  %v547_v59 = vld [vmem:[#allocation4 + $0x40] sm:$0xff] }
  0x1c   :  { %266 = vmatpush.msrb.mxu3 %v68_v19  ;;  %737 = vmatmul.msk.f32.gmra.mxu0 %vm115_vm0, %v929_v14  ;;  %v550_v51 = vld [vmem:[#allocation4 + $0x58] sm:$0xff]  ;;  %v568_v62 = vld [vmem:[#allocation4 + $0xe8] sm:$0xff]  ;;  %v545_v63 = vld [vmem:[#allocation4 + $0x30] sm:$0xff] }
  0x1d   :  { %752 = vmatmul.msk.f32.gmra.mxu2 %vm115_vm0, %v942_v20  ;;  %757 = vmatmul.msk.f32.vlgmr.msrb.gmra.mxu3 %vm115_vm0, %v919_v12  ;;  %v570_v52 = vld [vmem:[#allocation4 + $0xf8] sm:$0xff]  ;;  %v567_v0 = vld [vmem:[#allocation4 + $0xe0] sm:$0xff]  ;;  %v544_v2 = vld [vmem:[#allocation4 + $0x28] sm:$0xff] }
  0x1e   :  { %800 = vmatpush.msra.mxu3 %v93_v21  ;;  %228 = vmatpush.msrb.mxu0 %v67_v11  ;;  %v546_v60 = vld [vmem:[#allocation4 + $0x38] sm:$0xff]  ;;  %v543_v6 = vld [vmem:[#allocation4 + $0x20] sm:$0xff]  ;;  %v541_v8 = vld [vmem:[#allocation4 + $0x10] sm:$0xff] }
  0x1f   :  { %744 = vmatmul.msk.f32.gmra.mxu1 %vm115_vm0, %v929_v14  ;;  %379 = vmatpush.msrb.mxu2 %v79_v24  ;;  %v566_v1 = vld [vmem:[#allocation4 + $0xd8] sm:$0xff]  ;;  %v540_v10 = vld [vmem:[#allocation4 + $0x8] sm:$0xff]  ;;  %v539_v16 = vld [vmem:[#allocation4] sm:$0xff] }
  0x20   :  { %801 = vmatpush.msra.mxu3 %v85_v22  ;;  %301 = vmatpush.msra.mxu0 %v93_v21  ;;  %v542_v7 = vld [vmem:[#allocation4 + $0x18] sm:$0xff]  ;;  %v563_v17 = vld [vmem:[#allocation4 + $0xc0] sm:$0xff]  ;;  %v561_v23 = vld [vmem:[#allocation4 + $0xb0] sm:$0xff] }
  0x21   :  { %380 = vmatpush.msrb.mxu2 %v71_v27  ;;  %341 = vmatpush.msrb.mxu1 %v78_v34  ;;  %v562_v18 = vld [vmem:[#allocation4 + $0xb8] sm:$0xff]  ;;  %v560_v24 = vld [vmem:[#allocation4 + $0xa8] sm:$0xff]  ;;  %v1092_v25 = vld [vmem:[%s1289_s2] sm:$0xff] }
  0x22   :  { %802 = vmatpush.msra.mxu3 %v77_v26  ;;  %302 = vmatpush.msra.mxu0 %v85_v22  ;;  %v559_v34 = vld [vmem:[#allocation4 + $0xa0] sm:$0xff] }
  0x23   :  { %342 = vmatpush.msrb.mxu1 %v70_v37  ;;  %v1113_v37 = vperm.slane %v1092_v25, 4 }
  0x24   :  { %738 = vmatmul.msk.f32.gmra.mxu0 %vm115_vm0, %v942_v20  ;;  %803 = vmatpush.msra.mxu3 %v69_v29 }
  0x25   :  { %753 = vmatmul.msk.f32.gmra.mxu2 %vm115_vm0, %v955_v28  ;;  %758 = vmatmul.msk.f32.gmra.mxu3 %vm115_vm0, %v929_v14 }
  0x26   :  { %303 = vmatpush.msra.mxu0 %v77_v26  ;;  %415 = vmatpush.msrb.mxu3 %v96_v33  ;;  %v1108_v33 = vperm.slane %v1092_v25, 2 }
  0x27   :  { %745 = vmatmul.msk.f32.gmra.mxu1 %vm115_vm0, %v942_v20 }
  0x28   :  { %304 = vmatpush.msra.mxu0 %v69_v29  ;;  %416 = vmatpush.msrb.mxu3 %v88_v35  ;;  %v1097_v29 = vperm.slane %v1092_v25, 6 }
  0x29   :  { %613 = vmatpush.msra.mxu1 %v570_v52 }
  0x2a   :  { %417 = vmatpush.msrb.mxu3 %v80_v36 }
  0x2b   :  { %614 = vmatpush.msra.mxu1 %v569_v54 }
  0x2c   :  { %739 = vmatmul.msk.f32.gmra.mxu0 %vm115_vm0, %v955_v28  ;;  %418 = vmatpush.msrb.mxu3 %v72_v38  ;;  %v558_v38 = vld [vmem:[#allocation4 + $0x98] sm:$0xff] }
  0x2d   :  { %754 = vmatmul.msk.f32.gmra.mxu2 %vm115_vm0, %v62_v30  ;;  %759 = vmatmul.msk.f32.gmra.mxu3 %vm115_vm0, %v942_v20 }
  0x2e   :  { %615 = vmatpush.msra.mxu1 %v568_v62 }
  0x2f   :  { %746 = vmatmul.msk.f32.gmra.mxu1 %vm115_vm0, %v955_v28 }
  0x30   :  { %616 = vmatpush.msra.mxu1 %v567_v0 }
  0x32   :  { %617 = vmatpush.msra.mxu1 %v566_v1 }
  0x34   :  { %740 = vmatmul.msk.f32.gmra.mxu0 %vm115_vm0, %v62_v30 }
  0x35   :  { %755 = vmatmul.msk.f32.gmra.mxu2 %vm115_vm0, %v63_v32  ;;  %760 = vmatmul.msk.f32.gmra.mxu3 %vm115_vm0, %v955_v28 }
  0x37   :  { %747 = vmatmul.msk.f32.gmra.mxu1 %vm115_vm0, %v62_v30 }
  0x3c   :  { %741 = vmatmul.msk.f32.gmra.mxu0 %vm115_vm0, %v63_v32 }
  0x3d   :  { %756 = vmatmul.msk.f32.gmra.mxu2 %vm115_vm0, %v924_v13  ;;  %761 = vmatmul.msk.f32.gmra.mxu3 %vm115_vm0, %v62_v30 }
  0x3f   :  { %748 = vmatmul.msk.f32.gmra.mxu1 %vm115_vm0, %v63_v32 }
  0x44   :  { %742 = vmatmul.msk.f32.gmra.mxu0 %vm115_vm0, %v924_v13 }
  0x45   :  { %762 = vmatmul.msk.f32.gmra.mxu3 %vm115_vm0, %v63_v32  ;;  %778 = vmatmul.msk.f32.vlgmr.msrb.gmra.mxu2 %vm115_vm0, %v919_v12 }
  0x47   :  { %771 = vmatmul.msk.f32.vlgmr.msrb.gmra.mxu1 %vm115_vm0, %v919_v12 }
  0x4c   :  { %750 = vmatmul.msk.f32.vlgmr.msrb.gmra.mxu0 %vm115_vm0, %v919_v12 }
  0x4d   :  { %763 = vmatmul.msk.f32.gmra.mxu3 %vm115_vm0, %v924_v13  ;;  %779 = vmatmul.msk.f32.gmra.mxu2 %vm115_vm0, %v929_v14 }
  0x4e   :  { %575 = vmatpush.msrb.mxu0 %v554_v43 }
  0x4f   :  { %772 = vmatmul.msk.f32.gmra.mxu1 %vm115_vm0, %v929_v14 }
  0x50   :  { %576 = vmatpush.msrb.mxu0 %v553_v44  ;;  %v1118_v44 = vperm.slane %v1092_v25, 3 }
  0x52   :  { %577 = vmatpush.msrb.mxu0 %v552_v45  ;;  %v557_v45 = vld [vmem:[#allocation4 + $0x90] sm:$0xff] }
  0x54   :  { %764 = vmatmul.msk.f32.vlgmr.msra.gmra.mxu0 %vm115_vm0, %v919_v12 }
  0x55   :  { %768 = vmatmul.msk.f32.vlgmr.msra.gmra.mxu3 %vm115_vm0, %v62_v30  ;;  %780 = vmatmul.msk.f32.gmra.mxu2 %vm115_vm0, %v942_v20 }
  0x56   :  { %578 = vmatpush.msrb.mxu0 %v551_v49 }
  0x57   :  { %773 = vmatmul.msk.f32.gmra.mxu1 %vm115_vm0, %v942_v20 }
  0x58   :  { %579 = vmatpush.msrb.mxu0 %v550_v51 }
  0x5a   :  { %580 = vmatpush.msrb.mxu0 %v549_v53 }
  0x5c   :  { %765 = vmatmul.msk.f32.gmra.mxu0 %vm115_vm0, %v929_v14 }
  0x5d   :  { %769 = vmatmul.msk.f32.gmra.mxu3 %vm115_vm0, %v63_v32  ;;  %781 = vmatmul.msk.f32.gmra.mxu2 %vm115_vm0, %v955_v28 }
  0x5e   :  { %581 = vmatpush.msrb.mxu0 %v548_v55 }
  0x5f   :  { %774 = vmatmul.msk.f32.gmra.mxu1 %vm115_vm0, %v955_v28 }
  0x60   :  { %582 = vmatpush.msrb.mxu0 %v547_v59 }
  0x62   :  { %583 = vmatpush.msrb.mxu0 %v546_v60 }
  0x64   :  { %766 = vmatmul.msk.f32.gmra.mxu0 %vm115_vm0, %v942_v20 }
  0x65   :  { %770 = vmatmul.msk.f32.gmra.mxu3 %vm115_vm0, %v924_v13  ;;  %782 = vmatmul.msk.f32.gmra.mxu2 %vm115_vm0, %v62_v30 }
  0x66   :  { %584 = vmatpush.msrb.mxu0 %v545_v63 }
  0x67   :  { %775 = vmatmul.msk.f32.gmra.mxu1 %vm115_vm0, %v62_v30 }
  0x68   :  { %585 = vmatpush.msrb.mxu0 %v544_v2 }
  0x6a   :  { %586 = vmatpush.msrb.mxu0 %v543_v6 }
  0x6c   :  { %767 = vmatmul.msk.f32.gmra.mxu0 %vm115_vm0, %v955_v28 }
  0x6d   :  { %783 = vmatmul.msk.f32.gmra.mxu2 %vm115_vm0, %v63_v32  ;;  %785 = vmatmul.msk.f32.vlgmr.msrb.gmra.mxu3 %vm115_vm0, %v919_v12 }
  0x6e   :  { %587 = vmatpush.msrb.mxu0 %v542_v7  ;;  %v556_v7 = vld [vmem:[#allocation4 + $0x88] sm:$0xff] }
  0x6f   :  { %776 = vmatmul.msk.f32.gmra.mxu1 %vm115_vm0, %v63_v32 }
  0x70   :  { %588 = vmatpush.msrb.mxu0 %v541_v8 }
  0x72   :  { %589 = vmatpush.msrb.mxu0 %v540_v10 }
  0x74   :  { %590 = vmatpush.msrb.mxu0 %v539_v16 }
  0x75   :  { %784 = vmatmul.msk.f32.gmra.mxu2 %vm115_vm0, %v924_v13  ;;  %786 = vmatmul.msk.f32.gmra.mxu3 %vm115_vm0, %v929_v14  ;;  %v564_v14 = vld [vmem:[#allocation4 + $0xc8] sm:$0xff] }
  0x77   :  { %777 = vmatmul.msk.f32.gmra.mxu1 %vm115_vm0, %v924_v13 }
  0x7d   :  { %787 = vmatmul.msk.f32.gmra.mxu3 %vm115_vm0, %v942_v20 }
  0x85   :  { %788 = vmatmul.msk.f32.gmra.mxu3 %vm115_vm0, %v955_v28 }
  0x8d   :  { %789 = vmatmul.msk.f32.gmra.mxu3 %vm115_vm0, %v62_v30  ;;  %v1100_v30 = vperm.slane %v1092_v25, 1 }
  0x91   :  { %v1040_v39 = vpop.f32.mrf.mxu0 }
  0x94   :  { %v1057_v50 = vpop.f32.mrf.mxu1 }
  0x95   :  { %790 = vmatmul.msk.f32.gmra.mxu3 %vm115_vm0, %v63_v32  ;;  %v1105_v32 = vperm.slane %v1092_v25, 0 }
  0x97   :  { %v155_v49 = vadd.f32 %v1040_v39, %v1105_v32 }
  0x98   :  { %v1043_v40 = vpop.f32.mrf.mxu3  ;;  %v1045_v41 = vpop.f32.mrf.mxu2 }
  0x99   :  { %v1047_v42 = vpop.f32.mrf.mxu0  ;;  %v211_v43 = vadd.f32 %v1043_v40, %v1100_v30  ;;  %v441_v63 = vmax.f32 %v155_v49, 0.0  ;;  %v234_v1 = vadd.f32 %v1045_v41, %v1108_v33 }
  0x9a   :  { %v158_v39 = vadd.f32 %v1047_v42, %v1105_v32 }
  0x9b   :  { %v490_v62 = vmax.f32 %v211_v43, 0.0 }
  0x9c   :  { %v1065_v61 = vpop.f32.mrf.mxu1  ;;  %v449_v41 = vmax.f32 %v158_v39, 0.0 }
  0x9d   :  { %791 = vmatmul.msk.f32.gmra.mxu3 %vm115_vm0, %v924_v13  ;;  %v565_v13 = vld [vmem:[#allocation4 + $0xd0] sm:$0xff] }
  0x9e   :  { %618 = vmatpush.msra.mxu1 %v565_v13 }
  0xa0   :  { %v1051_v46 = vpop.f32.mrf.mxu2  ;;  %v1053_v47 = vpop.f32.mrf.mxu3  ;;  %619 = vmatpush.msra.mxu1 %v564_v14  ;;  %v555_v14 = vld [vmem:[#allocation4 + $0x80] sm:$0xff] }
  0xa1   :  { %v1055_v48 = vpop.f32.mrf.mxu0 }
  0xa2   :  { %620 = vmatpush.msra.mxu1 %v563_v17 }
  0xa4   :  { %v1073_v9 = vpop.f32.mrf.mxu1  ;;  %621 = vmatpush.msra.mxu1 %v562_v18 }
  0xa6   :  { %622 = vmatpush.msra.mxu1 %v561_v23  ;;  %v451_v23 = vmax.f32 %v234_v1, 0.0 }
  0xa8   :  { %v1059_v56 = vpop.f32.mrf.mxu2  ;;  %v1061_v57 = vpop.f32.mrf.mxu3  ;;  %623 = vmatpush.msra.mxu1 %v560_v24 }
  0xa9   :  { %v1063_v58 = vpop.f32.mrf.mxu0 }
  0xaa   :  { %624 = vmatpush.msra.mxu1 %v559_v34  ;;  %v499_v34 = vmax.f32 %v449_v41, %v451_v23 }
  0xac   :  { %v1085_v21 = vpop.f32.mrf.mxu1  ;;  %625 = vmatpush.msra.mxu1 %v558_v38  ;;  %v161_v38 = vadd.f32 %v1055_v48, %v1105_v32  ;;  %v164_v48 = vadd.f32 %v1063_v58, %v1105_v32  ;;  %v193_v58 = vadd.f32 %v1057_v50, %v1100_v30 }
  0xae   :  { %626 = vmatpush.msra.mxu1 %v557_v45 }
  0xb0   :  { %v1067_v3 = vpop.f32.mrf.mxu2  ;;  %v1069_v4 = vpop.f32.mrf.mxu3  ;;  %627 = vmatpush.msra.mxu1 %v556_v7 }
  0xb1   :  { %v1071_v5 = vpop.f32.mrf.mxu0 }
  0xb2   :  { %628 = vmatpush.msra.mxu1 %v555_v14 }
  0xb4   :  { %v1102_v31 = vpop.f32.mrf.mxu1 }
  0xb8   :  { %v1075_v11 = vpop.f32.mrf.mxu2  ;;  %v1077_v12 = vpop.f32.mrf.mxu3 }
  0xb9   :  { %v1079_v15 = vpop.f32.mrf.mxu0 }
  0xbc   :  { %v1128_v2 = vpop.f32.mrf.mxu1 }
  0xc0   :  { %v1081_v19 = vpop.f32.mrf.mxu2  ;;  %v1083_v20 = vpop.f32.mrf.mxu3 }
  0xc1   :  { %v1087_v22 = vpop.f32.mrf.mxu0 }
  0xc8   :  { %v1094_v26 = vpop.f32.mrf.mxu3  ;;  %v382_v27 = vpop.f32.mrf.mxu2 }
  0xc9   :  { %v230_v28 = vpop.f32.mrf.mxu0  ;;  %v383_v35 = vadd.f32 %v382_v27, %v1097_v29 }
  0xca   :  { %v231_v36 = vadd.f32 %v230_v28, %v1108_v33 }
  0xcb   :  { %v447_v55 = vmax.f32 %v383_v35, 0.0  ;;  %v344_v35 = vpop.f32.mrf.mxu1 }
  0xcc   :  { %v443_v59 = vmax.f32 %v231_v36, 0.0  ;;  %v237_v36 = vadd.f32 %v1051_v46, %v1108_v33  ;;  %v240_v46 = vadd.f32 %v1059_v56, %v1108_v33 }
  0xce   :  { %v497_v8 = vmax.f32 %v441_v63, %v443_v59 }
  0xd0   :  { %v286_v51 = vpop.f32.mrf.mxu3  ;;  %v385_v52 = vpop.f32.mrf.mxu2 }
  0xd1   :  { %v287_v53 = vadd.f32 %v286_v51, %v1118_v44  ;;  %v306_v54 = vpop.f32.mrf.mxu0  ;;  %v386_v10 = vadd.f32 %v385_v52, %v1097_v29 }
  0xd2   :  { %v307_v60 = vadd.f32 %v306_v54, %v1113_v37  ;;  %v459_v54 = vmax.f32 %v237_v36, 0.0  ;;  %v167_v36 = vadd.f32 %v1071_v5, %v1105_v32  ;;  %v196_v5 = vadd.f32 %v1065_v61, %v1100_v30 }
  0xd3   :  { %v492_v40 = vmax.f32 %v287_v53, 0.0  ;;  %v455_v27 = vmax.f32 %v386_v10, 0.0  ;;  %v347_v1 = vpop.f32.mrf.mxu1  ;;  %v467_v10 = vmax.f32 %v240_v46, 0.0 }
  0xd4   :  { %v445_v0 = vmax.f32 %v307_v60, 0.0 }
  0xd5   :  { %v1130_v6 = vmax.f32 %v490_v62, %v492_v40 }
  0xd6   :  { %v511_v13 = vmax.f32 %v445_v0, %v447_v55  ;;  %v457_v55 = vmax.f32 %v161_v38, 0.0 }
  0xd8   :  { %v525_v16 = vmax.f32 %v497_v8, %v511_v13  ;;  %v318_v17 = vpop.f32.mrf.mxu3  ;;  %v388_v18 = vpop.f32.mrf.mxu2  ;;  %v501_v40 = vmax.f32 %v457_v55, %v459_v54  ;;  %v465_v13 = vmax.f32 %v164_v48, 0.0  ;;  %v473_v55 = vmax.f32 %v167_v36, 0.0 }
  0xd9   :  { %v309_v24 = vpop.f32.mrf.mxu0  ;;  %v389_v43 = vadd.f32 %v388_v18, %v1097_v29  ;;  %v319_v50 = vadd.f32 %v318_v17, %v1113_v37  ;;  %v272_v48 = vadd.f32 %v1061_v57, %v1118_v44 }
  0xda   :  { %v310_v42 = vadd.f32 %v309_v24, %v1113_v37  ;;  %591 = vmatmul.f32.vlgmr.msrb.gmra.mxu0 %v525_v16  ;;  %v1148_v16 = vperm.slane %v1092_v25, 5  ;;  %v269_v24 = vadd.f32 %v1053_v47, %v1118_v44  ;;  %v442_v47 = vmax.f32 %v193_v58, 0.0 }
  0xdb   :  { %v463_v59 = vmax.f32 %v389_v43, 0.0  ;;  %v452_v58 = vmax.f32 %v272_v48, 0.0 }
  0xdc   :  { %v453_v28 = vmax.f32 %v310_v42, 0.0  ;;  %v345_v42 = vadd.f32 %v344_v35, %v1148_v16 }
  0xde   :  { %v513_v45 = vmax.f32 %v453_v28, %v455_v27  ;;  %v503_v27 = vmax.f32 %v465_v13, %v467_v10  ;;  %v1158_v28 = vperm.slane %v1092_v25, 7  ;;  %v446_v54 = vmax.f32 %v345_v42, 0.0 }
  0xe0   :  { %v321_v49 = vpop.f32.mrf.mxu3  ;;  %v391_v51 = vpop.f32.mrf.mxu2  ;;  %v527_v52 = vmax.f32 %v499_v34, %v513_v45  ;;  %v243_v34 = vadd.f32 %v1067_v3, %v1108_v33 }
  0xe1   :  { %v312_v53 = vpop.f32.mrf.mxu0  ;;  %v392_v63 = vadd.f32 %v391_v51, %v1097_v29  ;;  %v350_v3 = vpop.f32.mrf.mxu1  ;;  %v322_v10 = vadd.f32 %v321_v49, %v1113_v37 }
  0xe2   :  { %v313_v60 = vadd.f32 %v312_v53, %v1113_v37  ;;  %594 = vmatmul.f32.gmra.mxu0 %v527_v52  ;;  %v444_v53 = vmax.f32 %v269_v24, 0.0  ;;  %v475_v25 = vmax.f32 %v243_v34, 0.0 }
  0xe3   :  { %v471_v18 = vmax.f32 %v392_v63, 0.0  ;;  %v348_v63 = vadd.f32 %v347_v1, %v1148_v16 }
  0xe4   :  { %v461_v62 = vmax.f32 %v313_v60, 0.0  ;;  %v498_v46 = vmax.f32 %v442_v47, %v444_v53 }
  0xe6   :  { %v515_v0 = vmax.f32 %v461_v62, %v463_v59  ;;  %v477_v59 = vmax.f32 %v319_v50, 0.0  ;;  %v275_v50 = vadd.f32 %v1069_v4, %v1118_v44 }
  0xe8   :  { %v1145_v39 = vpop.f32.mrf.mxu3  ;;  %v394_v7 = vpop.f32.mrf.mxu2  ;;  %v529_v8 = vmax.f32 %v501_v40, %v515_v0  ;;  %v505_v0 = vmax.f32 %v473_v55, %v475_v25  ;;  %v460_v25 = vmax.f32 %v275_v50, 0.0 }
  0xe9   :  { %v315_v14 = vpop.f32.mrf.mxu0  ;;  %v395_v23 = vadd.f32 %v394_v7, %v1097_v29  ;;  %v246_v7 = vadd.f32 %v1075_v11, %v1108_v33  ;;  %v353_v34 = vpop.f32.mrf.mxu1 }
  0xea   :  { %v316_v56 = vadd.f32 %v315_v14, %v1113_v37  ;;  %597 = vmatmul.f32.gmra.mxu0 %v529_v8  ;;  %v170_v8 = vadd.f32 %v1079_v15, %v1105_v32  ;;  %v199_v15 = vadd.f32 %v1073_v9, %v1100_v30  ;;  %v325_v9 = vadd.f32 %v1145_v39, %v1113_v37 }
  0xeb   :  { %v479_v43 = vmax.f32 %v395_v23, 0.0  ;;  %v454_v23 = vmax.f32 %v348_v63, 0.0  ;;  %v483_v1 = vmax.f32 %v246_v7, 0.0  ;;  %v278_v37 = vadd.f32 %v1077_v12, %v1118_v44  ;;  %v672_v12 = vld [vmem:[%s1292_s5 + $0x70] sm:$0xff] }
  0xec   :  { %v469_v41 = vmax.f32 %v316_v56, 0.0  ;;  %v450_v56 = vmax.f32 %v196_v5, 0.0  ;;  %v481_v24 = vmax.f32 %v170_v8, 0.0  ;;  %v354_v5 = vadd.f32 %v353_v34, %v1148_v16 }
  0xed   :  { %v519_v17 = vmax.f32 %v477_v59, %v479_v43  ;;  %v351_v43 = vadd.f32 %v350_v3, %v1148_v16 }
  0xee   :  { %v517_v38 = vmax.f32 %v469_v41, %v471_v18  ;;  %v500_v36 = vmax.f32 %v450_v56, %v452_v58  ;;  %v470_v7 = vmax.f32 %v354_v5, 0.0 }
  0xef   :  { %v533_v18 = vmax.f32 %v505_v0, %v519_v17  ;;  %v462_v4 = vmax.f32 %v351_v43, 0.0  ;;  %v468_v0 = vmax.f32 %v278_v37, 0.0  ;;  %v658_v37 = vld [vmem:[%s1292_s5] sm:$0xff] }
  0xf0   :  { %v397_v45 = vpop.f32.mrf.mxu2  ;;  %v420_v51 = vpop.f32.mrf.mxu3  ;;  %v531_v52 = vmax.f32 %v503_v27, %v517_v38  ;;  %v485_v27 = vmax.f32 %v322_v10, 0.0 }
  0xf1   :  { %v421_v35 = vadd.f32 %v420_v51, %v1158_v28  ;;  %v398_v62 = vadd.f32 %v397_v45, %v1097_v29  ;;  %v507_v45 = vmax.f32 %v481_v24, %v483_v1  ;;  %v249_v51 = vadd.f32 %v1081_v19, %v1108_v33 }
  0xf2   :  { %600 = vmatmul.f32.gmra.mxu0 %v531_v52  ;;  %v173_v52 = vadd.f32 %v1087_v22, %v1105_v32  ;;  %v202_v22 = vadd.f32 %v1085_v21, %v1100_v30  ;;  %v673_v21 = vld [vmem:[%s1292_s5 + $0x78] sm:$0xff] }
  0xf3   :  { %v448_v60 = vmax.f32 %v421_v35, 0.0  ;;  %v487_v13 = vmax.f32 %v398_v62, 0.0  ;;  %v458_v35 = vmax.f32 %v199_v15, 0.0  ;;  %v491_v59 = vmax.f32 %v249_v51, 0.0  ;;  %v356_v62 = vpop.f32.mrf.mxu1  ;;  %678 = vmatpush.msra.mxu2 %v673_v21  ;;  %v668_v15 = vld [vmem:[%s1292_s5 + $0x50] sm:$0xff] }
  0xf4   :  { %v489_v3 = vmax.f32 %v173_v52, 0.0  ;;  %v466_v63 = vmax.f32 %v202_v22, 0.0  ;;  %v357_v58 = vadd.f32 %v356_v62, %v1148_v16  ;;  %v661_v22 = vld [vmem:[%s1292_s5 + $0x18] sm:$0xff] }
  0xf5   :  { %v512_v40 = vmax.f32 %v446_v54, %v448_v60  ;;  %v521_v49 = vmax.f32 %v485_v27, %v487_v13  ;;  %v493_v60 = vmax.f32 %v325_v9, 0.0  ;;  %v502_v33 = vmax.f32 %v458_v35, %v460_v25  ;;  %679 = vmatpush.msra.mxu2 %v672_v12 }
  0xf6   :  { %v509_v17 = vmax.f32 %v489_v3, %v491_v59  ;;  %v205_v13 = vadd.f32 %v1102_v31, %v1100_v30  ;;  %v667_v3 = vld [vmem:[%s1292_s5 + $0x48] sm:$0xff] }
  0xf7   :  { %v526_v61 = vmax.f32 %v498_v46, %v512_v40  ;;  %v535_v54 = vmax.f32 %v507_v45, %v521_v49 }
  0xf8   :  { %v423_v14 = vpop.f32.mrf.mxu3  ;;  %v400_v57 = vpop.f32.mrf.mxu2  ;;  %v474_v24 = vmax.f32 %v205_v13, 0.0 }
  0xf9   :  { %v424_v41 = vadd.f32 %v423_v14, %v1158_v28  ;;  %629 = vmatmul.f32.vlgmr.msra.gmra.mxu1 %v526_v61  ;;  %v401_v42 = vadd.f32 %v400_v57, %v1097_v29  ;;  %v671_v61 = vld [vmem:[%s1292_s5 + $0x68] sm:$0xff]  ;;  %v504_v14 = vmax.f32 %v466_v63, %v468_v0 }
  0xfa   :  { %603 = vmatmul.f32.gmra.mxu0 %v533_v18  ;;  %v281_v18 = vadd.f32 %v1083_v20, %v1118_v44  ;;  %680 = vmatpush.msra.mxu2 %v671_v61 }
  0xfb   :  { %v456_v11 = vmax.f32 %v424_v41, 0.0  ;;  %v495_v29 = vmax.f32 %v401_v42, 0.0  ;;  %v669_v41 = vld [vmem:[%s1292_s5 + $0x58] sm:$0xff]  ;;  %v359_v31 = vpop.f32.mrf.mxu1  ;;  %v208_v42 = vadd.f32 %v1128_v2, %v1100_v30 }
  0xfc   :  { %v476_v27 = vmax.f32 %v281_v18, 0.0 }
  0xfd   :  { %v514_v38 = vmax.f32 %v454_v23, %v456_v11  ;;  %v523_v32 = vmax.f32 %v493_v60, %v495_v29  ;;  %v670_v23 = vld [vmem:[%s1292_s5 + $0x60] sm:$0xff]  ;;  %v478_v11 = vmax.f32 %v357_v58, 0.0  ;;  %v482_v51 = vmax.f32 %v208_v42, 0.0 }
  0xfe   :  { %681 = vmatpush.msra.mxu2 %v670_v23  ;;  %v506_v34 = vmax.f32 %v474_v24, %v476_v27  ;;  %v666_v60 = vld [vmem:[%s1292_s5 + $0x40] sm:$0xff] }
  0xff   :  { %v528_v47 = vmax.f32 %v500_v36, %v514_v38  ;;  %v537_v40 = vmax.f32 %v509_v17, %v523_v32  ;;  %v284_v36 = vadd.f32 %v1094_v26, %v1118_v44  ;;  %v360_v38 = vadd.f32 %v359_v31, %v1148_v16  ;;  %v660_v32 = vld [vmem:[%s1292_s5 + $0x10] sm:$0xff]  ;;  %v810_v17 = vld [vmem:[%s1291_s4] ss:$0 sm:$0xff] }
 0x100   :  { %v426_v53 = vpop.f32.mrf.mxu3  ;;  %682 = vmatpush.msra.mxu2 %v669_v41 }
 0x101   :  { %v427_v55 = vadd.f32 %v426_v53, %v1158_v28  ;;  %632 = vmatmul.f32.gmra.mxu1 %v528_v47  ;;  %v484_v52 = vmax.f32 %v284_v36, 0.0  ;;  %v486_v9 = vmax.f32 %v360_v38, 0.0 }
 0x102   :  { %606 = vmatmul.f32.gmra.mxu0 %v535_v54  ;;  %683 = vmatpush.msra.mxu2 %v668_v15 }
 0x103   :  { %v464_v19 = vmax.f32 %v427_v55, 0.0  ;;  %v362_v29 = vpop.f32.mrf.mxu1  ;;  %v508_v54 = vmax.f32 %v482_v51, %v484_v52 }
 0x104   :  { %v363_v2 = vadd.f32 %v362_v29, %v1148_v16  ;;  %684 = vmatpush.msra.mxu2 %v667_v3  ;;  %v665_v16 = vld [vmem:[%s1292_s5 + $0x38] sm:$0xff] }
 0x105   :  { %v516_v39 = vmax.f32 %v462_v4, %v464_v19  ;;  %v662_v19 = vld [vmem:[%s1292_s5 + $0x20] sm:$0xff] }
 0x106   :  { %v494_v26 = vmax.f32 %v363_v2, 0.0  ;;  %685 = vmatpush.msra.mxu2 %v666_v60 }
 0x107   :  { %v530_v46 = vmax.f32 %v502_v33, %v516_v39  ;;  %v659_v33 = vld [vmem:[%s1292_s5 + $0x8] sm:$0xff] }
 0x108   :  { %v429_v48 = vpop.f32.mrf.mxu3  ;;  %686 = vmatpush.msra.mxu2 %v665_v16 }
 0x109   :  { %v430_v8 = vadd.f32 %v429_v48, %v1158_v28  ;;  %635 = vmatmul.f32.gmra.mxu1 %v530_v46 }
 0x10a   :  { %609 = vmatmul.f32.gmra.mxu0 %v537_v40 }
 0x10b   :  { %v472_v10 = vmax.f32 %v430_v8, 0.0 }
 0x10d   :  { %v518_v56 = vmax.f32 %v470_v7, %v472_v10 }
 0x10f   :  { %v532_v57 = vmax.f32 %v504_v14, %v518_v56 }
 0x110   :  { %v432_v1 = vpop.f32.mrf.mxu3 }
 0x111   :  { %v433_v20 = vadd.f32 %v432_v1, %v1158_v28  ;;  %638 = vmatmul.f32.gmra.mxu1 %v532_v57 }
 0x113   :  { %v480_v49 = vmax.f32 %v433_v20, 0.0 }
 0x115   :  { %v520_v50 = vmax.f32 %v478_v11, %v480_v49 }
 0x117   :  { %v534_v43 = vmax.f32 %v506_v34, %v520_v50 }
 0x118   :  { %v435_v45 = vpop.f32.mrf.mxu3 }
 0x119   :  { %v436_v47 = vadd.f32 %v435_v45, %v1158_v28  ;;  %641 = vmatmul.f32.gmra.mxu1 %v534_v43  ;;  %v811_v43 = vld [vmem:[%s1293_s6] ss:$0 sm:$0xff] }
 0x11b   :  { %v488_v53 = vmax.f32 %v436_v47, 0.0 }
 0x11d   :  { %v522_v30 = vmax.f32 %v486_v9, %v488_v53 }
 0x11f   :  { %v536_v35 = vmax.f32 %v508_v54, %v522_v30 }
 0x120   :  { %v438_v25 = vpop.f32.mrf.mxu3 }
 0x121   :  { %v439_v44 = vadd.f32 %v438_v25, %v1158_v28  ;;  %644 = vmatmul.f32.gmra.mxu1 %v536_v35  ;;  %v663_v28 = vld [vmem:[%s1292_s5 + $0x28] sm:$0xff] }
 0x123   :  { %v496_v4 = vmax.f32 %v439_v44, 0.0 }
 0x125   :  { %v524_v55 = vmax.f32 %v494_v26, %v496_v4 }
 0x127   :  { %v538_v59 = vmax.f32 %v1130_v6, %v524_v55  ;;  %v664_v6 = vld [vmem:[%s1292_s5 + $0x30] sm:$0xff] }
 0x128   :  { %687 = vmatpush.msra.mxu2 %v664_v6 }
 0x129   :  { %647 = vmatmul.f32.gmra.mxu1 %v538_v59 }
 0x12a   :  { %688 = vmatpush.msra.mxu2 %v663_v28 }
 0x12c   :  { %689 = vmatpush.msra.mxu2 %v662_v19 }
 0x12e   :  { %690 = vmatpush.msra.mxu2 %v661_v22 }
 0x130   :  { %691 = vmatpush.msra.mxu2 %v660_v32 }
 0x132   :  { %692 = vmatpush.msra.mxu2 %v659_v33 }
 0x134   :  { %693 = vmatpush.msra.mxu2 %v658_v37 }
 0x157   :  { %v592_v39 = vpop.f32.mrf.mxu0 }
 0x158   :  { %v593_v62 = vadd.f32 %v810_v17, %v592_v39 }
 0x15f   :  { %v595_v5 = vpop.f32.mrf.mxu0 }
 0x160   :  { %v596_v0 = vadd.f32 %v810_v17, %v595_v5 }
 0x167   :  { %v598_v63 = vpop.f32.mrf.mxu0 }
 0x168   :  { %v599_v10 = vadd.f32 %v810_v17, %v598_v63 }
 0x16f   :  { %v601_v12 = vpop.f32.mrf.mxu0 }
 0x170   :  { %v602_v18 = vadd.f32 %v810_v17, %v601_v12 }
 0x176   :  { %v630_v46 = vpop.f32.mrf.mxu1 }
 0x177   :  { %v631_v48 = vadd.f32 %v630_v46, %v593_v62  ;;  %v604_v56 = vpop.f32.mrf.mxu0 }
 0x178   :  { %v605_v41 = vadd.f32 %v810_v17, %v604_v56 }
 0x179   :  { %v651_v40 = vmax.f32 %v631_v48, 0.0 }
 0x17b   :  { %694 = vmatmul.f32.vlgmr.msra.gmra.mxu2 %v651_v40 }
 0x17e   :  { %v633_v7 = vpop.f32.mrf.mxu1 }
 0x17f   :  { %v634_v8 = vadd.f32 %v633_v7, %v596_v0  ;;  %v607_v24 = vpop.f32.mrf.mxu0 }
 0x180   :  { %v608_v11 = vadd.f32 %v810_v17, %v607_v24 }
 0x181   :  { %v652_v21 = vmax.f32 %v634_v8, 0.0 }
 0x183   :  { %697 = vmatmul.f32.gmra.mxu2 %v652_v21 }
 0x186   :  { %v636_v61 = vpop.f32.mrf.mxu1 }
 0x187   :  { %v637_v13 = vadd.f32 %v636_v61, %v599_v10  ;;  %v610_v42 = vpop.f32.mrf.mxu0 }
 0x188   :  { %v611_v34 = vadd.f32 %v810_v17, %v610_v42 }
 0x189   :  { %v653_v14 = vmax.f32 %v637_v13, 0.0 }
 0x18b   :  { %700 = vmatmul.f32.gmra.mxu2 %v653_v14 }
 0x18e   :  { %v639_v58 = vpop.f32.mrf.mxu1 }
 0x18f   :  { %v640_v23 = vadd.f32 %v639_v58, %v602_v18 }
 0x191   :  { %v654_v57 = vmax.f32 %v640_v23, 0.0 }
 0x193   :  { %703 = vmatmul.f32.gmra.mxu2 %v654_v57 }
 0x196   :  { %v642_v1 = vpop.f32.mrf.mxu1 }
 0x197   :  { %v643_v31 = vadd.f32 %v642_v1, %v605_v41 }
 0x199   :  { %v655_v27 = vmax.f32 %v643_v31, 0.0 }
 0x19b   :  { %706 = vmatmul.f32.gmra.mxu2 %v655_v27 }
 0x19e   :  { %v645_v20 = vpop.f32.mrf.mxu1 }
 0x19f   :  { %v646_v15 = vadd.f32 %v645_v20, %v608_v11 }
 0x1a1   :  { %v656_v49 = vmax.f32 %v646_v15, 0.0 }
 0x1a3   :  { %709 = vmatmul.f32.gmra.mxu2 %v656_v49 }
 0x1a6   :  { %v648_v36 = vpop.f32.mrf.mxu1 }
 0x1a7   :  { %v649_v50 = vadd.f32 %v648_v36, %v611_v34 }
 0x1a9   :  { %v657_v38 = vmax.f32 %v649_v50, 0.0 }
 0x1ab   :  { %712 = vmatmul.f32.gmra.mxu2 %v657_v38 }
 0x1fe   :  { %v695_v45 = vpop.f32.mrf.mxu2 }
 0x1ff   :  { %v696_v51 = vadd.f32 %v811_v43, %v695_v45 }
 0x201   :  { %v716_v52 = vmax.f32 %v696_v51, 0.0 }
 0x203   :  { %723 = vst [vmem:[%s1294_s7] sm:$0xff] %v716_v52 }
 0x206   :  { %v698_v9 = vpop.f32.mrf.mxu2 }
 0x207   :  { %v699_v47 = vadd.f32 %v811_v43, %v698_v9 }
 0x209   :  { %v717_v29 = vmax.f32 %v699_v47, 0.0 }
 0x20b   :  { %724 = vst [vmem:[%s1294_s7 + $0x8] sm:$0xff] %v717_v29 }
 0x20e   :  { %v701_v53 = vpop.f32.mrf.mxu2 }
 0x20f   :  { %v702_v54 = vadd.f32 %v811_v43, %v701_v53 }
 0x211   :  { %v718_v30 = vmax.f32 %v702_v54, 0.0 }
 0x213   :  { %725 = vst [vmem:[%s1294_s7 + $0x10] sm:$0xff] %v718_v30 }
 0x216   :  { %v704_v2 = vpop.f32.mrf.mxu2 }
 0x217   :  { %v705_v35 = vadd.f32 %v811_v43, %v704_v2 }
 0x219   :  { %v719_v25 = vmax.f32 %v705_v35, 0.0 }
 0x21b   :  { %726 = vst [vmem:[%s1294_s7 + $0x18] sm:$0xff] %v719_v25 }
 0x21e   :  { %v707_v26 = vpop.f32.mrf.mxu2 }
 0x21f   :  { %v708_v44 = vadd.f32 %v811_v43, %v707_v26 }
 0x221   :  { %v720_v4 = vmax.f32 %v708_v44, 0.0 }
 0x223   :  { %727 = vst [vmem:[%s1294_s7 + $0x20] sm:$0xff] %v720_v4 }
 0x226   :  { %v710_v55 = vpop.f32.mrf.mxu2 }
 0x227   :  { %v711_v59 = vadd.f32 %v811_v43, %v710_v55 }
 0x229   :  { %v721_v3 = vmax.f32 %v711_v59, 0.0 }
 0x22b   :  { %728 = vst [vmem:[%s1294_s7 + $0x28] sm:$0xff] %v721_v3 }
 0x22e   :  { %v713_v60 = vpop.f32.mrf.mxu2 }
 0x22f   :  { %v714_v16 = vadd.f32 %v811_v43, %v713_v60 }
 0x231   :  { %v722_v6 = vmax.f32 %v714_v16, 0.0 }
 0x233   :  { %729 = vst [vmem:[%s1294_s7 + $0x30] sm:$0xff] %v722_v6 }
 0x234   :  { %734 = vsyncpa [#allocation3], 1 }
 0x235   :  { %735 = vsyncpa [#allocation5], 1 }

</bundles_post_ra>
